<compile_context>
chip_gen: v7x
topology: tpu7x:2x2x1
jax: 0.10.0
libtpu: 0.0.40
codegen_flags: <defaults>
</compile_context>

<pallas_src>
import functools

import jax
import jax.numpy as jnp
from jax.experimental import pallas as pl
from jax.experimental.pallas import tpu as pltpu


def _round_up(v, m):
    return ((v + m - 1) // m) * m


# ------------------------- generation-aware config -------------------------
_GEN_CONFIG = {
    # tm_align: MXU-aligned row tile granularity; vmem_budget: tile-selection
    # budget; vmem_cap: ceiling for vmem_limit_bytes; two_tc: shardable grid.
    "v7x":     dict(tm_align=256, vmem_budget=40 << 20, vmem_cap=48 << 20, two_tc=True),
    "v6e":     dict(tm_align=256, vmem_budget=80 << 20, vmem_cap=96 << 20, two_tc=False),
    "v5e":     dict(tm_align=128, vmem_budget=80 << 20, vmem_cap=96 << 20, two_tc=False),
    "unknown": dict(tm_align=128, vmem_budget=24 << 20, vmem_cap=48 << 20, two_tc=False),
}


def _chip_generation():
    try:
        kind = jax.devices()[0].device_kind.lower()
    except Exception:
        return "unknown"
    if "v7" in kind or "7x" in kind:
        return "v7x"
    if "v6" in kind:
        return "v6e"
    if "v5" in kind:
        return "v5e"
    return "unknown"


def _vmem_capacity_bytes():
    try:
        return int(pltpu.get_tpu_info().vmem_capacity_bytes)
    except Exception:
        return None


# --------------------------------- kernel ----------------------------------
def _mlp_kernel(x_ref, w1_ref, b1_ref, w2_ref, b2_ref, o_ref):
    # x_ref : (tm, F_in)              input dtype (f32 or bf16)
    # w1_ref: (F_in, H_p)  compute dt    b1_ref: (1, H_p)      f32
    # w2_ref: (H_p, F_out_p) compute dt  b2_ref: (1, F_out_p)  f32
    # o_ref : (tm, F_out_p)           output dtype
    x = x_ref[...].astype(w1_ref.dtype)
    h = jnp.dot(x, w1_ref[...], preferred_element_type=jnp.float32)
    h = jnp.maximum(h + b1_ref[...], 0.0)                       # bias + ReLU (f32)
    o = jnp.dot(h.astype(w2_ref.dtype), w2_ref[...],
                preferred_element_type=jnp.float32)
    o_ref[...] = (o + b2_ref[...]).astype(o_ref.dtype)


# ---------------------- one-time weight preparation ------------------------
def _prepare_clap_params(w1, b1, w2, b2, compute_dtype):
    """Transpose/cast/pad nn.Linear params once (outside the hot path).

    Returns ((w1_t, b1_2d, w2_t, b2_2d), (F_in, H_p, F_out, F_out_p)).
    Padding is zeros everywhere, so padded hidden units are relu(0)=0 and
    padded w2 rows/cols contribute nothing -> exact forward semantics.
    """
    H, F_in = w1.shape
    F_out = w2.shape[0]

    # Lane-dense contraction dim for the second matmul.
    H_p = _round_up(H, 128)
    # Lane-dense output stores only when the padding does not force an extra
    # full-output depad pass to dominate (small F_out: keep exact width).
    F_out_p = _round_up(F_out, 128) if F_out >= 128 else F_out

    w1_t = w1.T.astype(compute_dtype)                   # (F_in, H)
    w2_t = w2.T.astype(compute_dtype)                   # (H, F_out)
    b1_2d = b1.reshape(1, H).astype(jnp.float32)
    b2_2d = b2.reshape(1, F_out).astype(jnp.float32)

    if H_p != H:
        w1_t = jnp.pad(w1_t, ((0, 0), (0, H_p - H)))
        b1_2d = jnp.pad(b1_2d, ((0, 0), (0, H_p - H)))
        w2_t = jnp.pad(w2_t, ((0, H_p - H), (0, 0)))
    if F_out_p != F_out:
        # Keep w2/b2 padding paired (both zero) so sliced-away columns are
        # always the padded ones.
        w2_t = jnp.pad(w2_t, ((0, 0), (0, F_out_p - F_out)))
        b2_2d = jnp.pad(b2_2d, ((0, 0), (0, F_out_p - F_out)))

    params = (jnp.asarray(w1_t), jnp.asarray(b1_2d),
              jnp.asarray(w2_t), jnp.asarray(b2_2d))
    return params, (F_in, H_p, F_out, F_out_p)


# ------------------------------ forward factory -----------------------------
def make_feature_extraction_clap(w1, b1, w2, b2, *,
                                 compute_dtype=jnp.bfloat16,
                                 tm=512, out_dtype=None):
    """Build a jitted forward(x) equivalent to Feature_extraction_CLAPModel.

    x : (S, F_in) or (B, S, F_in)  ->  (B, S, F_out)   (B = 1 for 2-D input)
    Weight transpose/cast/pad happens once here, not per call.
    """
    gen = _chip_generation()
    cfg = _GEN_CONFIG.get(gen, _GEN_CONFIG["unknown"])
    cap = _vmem_capacity_bytes()
    if cap:
        vmem_budget = (cap * 3) // 5          # ~60% of physical VMEM
        vmem_cap = (cap * 3) // 4             # ~75% ceiling for vmem_limit
    else:
        vmem_budget = cfg["vmem_budget"]
        vmem_cap = cfg["vmem_cap"]
    tm_align = cfg["tm_align"]
    two_tc = cfg["two_tc"]

    params, (F_in, H_p, F_out, F_out_p) = _prepare_clap_params(
        w1, b1, w2, b2, compute_dtype)

    wbytes = jnp.dtype(compute_dtype).itemsize
    weight_bytes = (F_in * H_p + H_p * F_out_p) * wbytes + (H_p + F_out_p) * 4

    @jax.jit
    def _fwd(x, w1_t, b1_2d, w2_t, b2_2d):
        if x.ndim == 2:
            x = x[None]                                  # torch unsqueeze(0)
        B, S, _ = x.shape
        M = B * S
        x2 = x.reshape(M, F_in)                          # contiguous view

        o_dtype = out_dtype if out_dtype is not None else x.dtype
        xbytes = jnp.dtype(x.dtype).itemsize
        obytes = jnp.dtype(o_dtype).itemsize

        def _vmem_est(t):
            return (weight_bytes                         # Buffered(1) weights: once
                    + 2 * t * F_in * xbytes              # double-buffered x tile
                    + 2 * t * F_out_p * obytes           # double-buffered out tile
                    + t * H_p * 4 + t * F_out_p * 4)     # f32 intermediates

        # ---------------- MXU-aligned row-tile selection -------------------
        M8 = _round_up(M, 8)
        tm_eff = max(8, min(_round_up(tm, tm_align), M8))
        while tm_eff > tm_align and _vmem_est(tm_eff) > vmem_budget:
            tm_eff = _round_up(tm_eff // 2, tm_align)
        while tm_eff > 8 and _vmem_est(tm_eff) > vmem_budget:
            tm_eff = _round_up(tm_eff // 2, 8)
        # TODO(synk): if weight_bytes alone exceeds the budget (huge H / F_in),
        # add a K/N grid axis instead of keeping both weight matrices resident.

        grid_m = pl.cdiv(M, tm_eff)
        # Only v7x has 2 TensorCores: force >= 2 grid steps there so the
        # parallel row axis can shard; on v5e/v6e it is pure grid overhead.
        if two_tc and grid_m < 2 and M8 >= 2 * tm_align:
            tm_eff = _round_up(pl.cdiv(M8, 2), tm_align)
            grid_m = pl.cdiv(M, tm_eff)

        cost = pl.CostEstimate(
            flops=2 * M * (F_in * H_p + H_p * F_out_p),
            transcendentals=0,
            bytes_accessed=(M * F_in * xbytes + M * F_out_p * obytes
                            + weight_bytes),
        )

        resident = pl.Buffered(1)   # constant block index -> no double buffer
        out2 = pl.pallas_call(
            _mlp_kernel,
            out_shape=jax.ShapeDtypeStruct((M, F_out_p), o_dtype),
            grid_spec=pltpu.PrefetchScalarGridSpec(
                num_scalar_prefetch=0,
                grid=(grid_m,),
                in_specs=[
                    # TODO(synk): bump to pl.Buffered(3) if a profile shows
                    # exposed DMA on the x stream.
                    pl.BlockSpec((tm_eff, F_in), lambda i: (i, 0)),      # x rows
                    pl.BlockSpec((F_in, H_p), lambda i: (0, 0),
                                 pipeline_mode=resident),                # W1^T
                    pl.BlockSpec((1, H_p), lambda i: (0, 0),
                                 pipeline_mode=resident),                # b1
                    pl.BlockSpec((H_p, F_out_p), lambda i: (0, 0),
                                 pipeline_mode=resident),                # W2^T
                    pl.BlockSpec((1, F_out_p), lambda i: (0, 0),
                                 pipeline_mode=resident),                # b2
                ],
                out_specs=pl.BlockSpec((tm_eff, F_out_p), lambda i: (i, 0)),
            ),
            compiler_params=pltpu.CompilerParams(
                dimension_semantics=("parallel",),
                vmem_limit_bytes=int(min(max(_vmem_est(tm_eff) + (4 << 20),
                                             16 << 20), vmem_cap)),
            ),
            cost_estimate=cost,
        )(x2, w1_t, b1_2d, w2_t, b2_2d)

        if F_out_p != F_out:
            out2 = out2[:, :F_out]
        return out2.reshape(B, S, F_out)

    def forward(x):
        return _fwd(x, *params)

    return forward


def feature_extraction_clap_forward(x, w1, b1, w2, b2, **kwargs):
    """One-shot convenience wrapper (prefer the factory for repeated calls)."""
    return make_feature_extraction_clap(w1, b1, w2, b2, **kwargs)(x)


def _init_linear(key, out_features, in_features, dtype=jnp.float32):
    """Deterministic nn.Linear-style init (uniform in +-1/sqrt(in))."""
    kw, kb = jax.random.split(key)
    bound = 1.0 / (in_features ** 0.5)
    w = jax.random.uniform(kw, (out_features, in_features), dtype,
                           minval=-bound, maxval=bound)
    b = jax.random.uniform(kb, (out_features,), dtype,
                           minval=-bound, maxval=bound)
    return w, b


if __name__ == "__main__":
    key = jax.random.PRNGKey(0)
    k_x, k_fc1, k_fc2 = jax.random.split(key, 3)

    # Small CLAP-feature-like shapes: batch=2, seq=8, in=64, hidden=128, out=64
    B, S, F_in, H, F_out = 2, 8, 64, 128, 64
    x = jax.random.normal(k_x, (B, S, F_in), jnp.float32)
    w1, b1 = _init_linear(k_fc1, H, F_in)
    w2, b2 = _init_linear(k_fc2, F_out, H)

    # Pure-JAX f32 reference of the module's forward pass.
    ref = jnp.maximum(x @ w1.T + b1, 0.0) @ w2.T + b2

    # Default path: bf16 MXU operands, f32 accumulation; weights prepared once.
    fwd_bf16 = make_feature_extraction_clap(w1, b1, w2, b2)
    out = jax.block_until_ready(fwd_bf16(x))
    assert out.shape == (B, S, F_out)
    assert jnp.allclose(out, ref, atol=5e-2, rtol=5e-2)

    # Second call reuses the cached prepared weights + compiled executable.
    out_again = jax.block_until_ready(fwd_bf16(x))
    assert jnp.allclose(out_again, out)

    # Full-f32 compute path: must match the reference tightly.
    fwd_f32 = make_feature_extraction_clap(w1, b1, w2, b2,
                                           compute_dtype=jnp.float32)
    out_f32 = jax.block_until_ready(fwd_f32(x))
    assert jnp.allclose(out_f32, ref, atol=1e-5, rtol=1e-5)

    # 2-D input path (gets unsqueezed like the torch code).
    out2d = jax.block_until_ready(fwd_bf16(x[0]))
    assert out2d.shape == (1, S, F_out)
    assert jnp.allclose(out2d, ref[0:1], atol=5e-2, rtol=5e-2)

    # bf16 activation I/O path (halves x-in / out-out HBM traffic).
    fwd_bf16_io = make_feature_extraction_clap(w1, b1, w2, b2,
                                               out_dtype=jnp.bfloat16)
    out_bf = jax.block_until_ready(fwd_bf16_io(x.astype(jnp.bfloat16)))
    assert out_bf.dtype == jnp.bfloat16
    assert jnp.allclose(out_bf.astype(jnp.float32), ref, atol=1e-1, rtol=1e-1)

    print("KERNEL_OK")
</pallas_src>

<mosaic_0001>
module attributes {stable_mosaic.version = 11 : i64} {
  func.func @_mlp_kernel(%arg0: i32, %arg1: memref<16x64xf32, #tpu.memory_space<vmem>>, %arg2: memref<64x128xbf16, #tpu.memory_space<vmem>>, %arg3: memref<1x128xf32, #tpu.memory_space<vmem>>, %arg4: memref<128x64xbf16, #tpu.memory_space<vmem>>, %arg5: memref<1x64xf32, #tpu.memory_space<vmem>>, %arg6: memref<16x64xf32, #tpu.memory_space<vmem>>) attributes {dimension_semantics = [#tpu.dimension_semantics<parallel>], iteration_bounds = array<i64: 1>, scalar_prefetch = 0 : i64, scratch_operands = 0 : i64, tpu.core_type = #tpu.core_type<tc>, window_params = [{transform_indices = @transform_0, window_bounds = array<i64: 16, 64>}, {pipeline_mode = #tpu.pipeline_mode<synchronous>, transform_indices = @transform_1, window_bounds = array<i64: 64, 128>}, {pipeline_mode = #tpu.pipeline_mode<synchronous>, transform_indices = @transform_2, window_bounds = array<i64: 1, 128>}, {pipeline_mode = #tpu.pipeline_mode<synchronous>, transform_indices = @transform_3, window_bounds = array<i64: 128, 64>}, {pipeline_mode = #tpu.pipeline_mode<synchronous>, transform_indices = @transform_4, window_bounds = array<i64: 1, 64>}, {transform_indices = @transform_5, window_bounds = array<i64: 16, 64>}]} {
    %c0 = arith.constant 0 : index
    %c0_0 = arith.constant 0 : index
    %0 = vector.load %arg1[%c0, %c0_0] : memref<16x64xf32, #tpu.memory_space<vmem>>, vector<16x64xf32>
    %1 = arith.truncf %0 : vector<16x64xf32> to vector<16x64xbf16>
    %c0_1 = arith.constant 0 : index
    %c0_2 = arith.constant 0 : index
    %2 = vector.load %arg2[%c0_1, %c0_2] : memref<64x128xbf16, #tpu.memory_space<vmem>>, vector<64x128xbf16>
    %cst = arith.constant dense<0.000000e+00> : vector<16x128xf32>
    %3 = tpu.matmul %1, %2, %cst {dimension_numbers = #tpu.dot_dimension_numbers<[1], [0], [0], [1], [0, 0, 1, 1], [], []>} : vector<16x64xbf16>, vector<64x128xbf16>, vector<16x128xf32> -> vector<16x128xf32>
    %c0_3 = arith.constant 0 : index
    %c0_4 = arith.constant 0 : index
    %4 = vector.load %arg3[%c0_3, %c0_4] : memref<1x128xf32, #tpu.memory_space<vmem>>, vector<1x128xf32>
    %5 = vector.broadcast %4 : vector<1x128xf32> to vector<16x128xf32>
    %6 = arith.addf %3, %5 : vector<16x128xf32>
    %cst_5 = arith.constant 0.000000e+00 : f32
    %7 = vector.broadcast %cst_5 : f32 to vector<16x128xf32>
    %8 = arith.maximumf %6, %7 : vector<16x128xf32>
    %9 = arith.truncf %8 : vector<16x128xf32> to vector<16x128xbf16>
    %c0_6 = arith.constant 0 : index
    %c0_7 = arith.constant 0 : index
    %10 = vector.load %arg4[%c0_6, %c0_7] : memref<128x64xbf16, #tpu.memory_space<vmem>>, vector<128x64xbf16>
    %cst_8 = arith.constant dense<0.000000e+00> : vector<16x64xf32>
    %11 = tpu.matmul %9, %10, %cst_8 {dimension_numbers = #tpu.dot_dimension_numbers<[1], [0], [0], [1], [0, 0, 1, 1], [], []>} : vector<16x128xbf16>, vector<128x64xbf16>, vector<16x64xf32> -> vector<16x64xf32>
    %c0_9 = arith.constant 0 : index
    %c0_10 = arith.constant 0 : index
    %12 = vector.load %arg5[%c0_9, %c0_10] : memref<1x64xf32, #tpu.memory_space<vmem>>, vector<1x64xf32>
    %13 = vector.broadcast %12 : vector<1x64xf32> to vector<16x64xf32>
    %14 = arith.addf %11, %13 : vector<16x64xf32>
    %c0_11 = arith.constant 0 : index
    %c0_12 = arith.constant 0 : index
    %15 = vector.load %arg6[%c0_11, %c0_12] : memref<16x64xf32, #tpu.memory_space<vmem>>, vector<16x64xf32>
    tpu.vector_store %arg6[%c0_11, %c0_12], %14 {strides = array<i32>} : memref<16x64xf32, #tpu.memory_space<vmem>>, vector<16x64xf32>,
    return
  }
  func.func @transform_0(%arg0: i32) -> (i32, i32) {
    %c0_i32 = arith.constant 0 : i32
    %c0_i32_0 = arith.constant 0 : i32
    return %arg0, %c0_i32 : i32, i32
  }
  func.func @transform_1(%arg0: i32) -> (i32, i32) {
    %c0_i32 = arith.constant 0 : i32
    %c0_i32_0 = arith.constant 0 : i32
    %c0_i32_1 = arith.constant 0 : i32
    return %c0_i32, %c0_i32_0 : i32, i32
  }
  func.func @transform_2(%arg0: i32) -> (i32, i32) {
    %c0_i32 = arith.constant 0 : i32
    %c0_i32_0 = arith.constant 0 : i32
    %c0_i32_1 = arith.constant 0 : i32
    return %c0_i32, %c0_i32_0 : i32, i32
  }
  func.func @transform_3(%arg0: i32) -> (i32, i32) {
    %c0_i32 = arith.constant 0 : i32
    %c0_i32_0 = arith.constant 0 : i32
    %c0_i32_1 = arith.constant 0 : i32
    return %c0_i32, %c0_i32_0 : i32, i32
  }
  func.func @transform_4(%arg0: i32) -> (i32, i32) {
    %c0_i32 = arith.constant 0 : i32
    %c0_i32_0 = arith.constant 0 : i32
    %c0_i32_1 = arith.constant 0 : i32
    return %c0_i32, %c0_i32_0 : i32, i32
  }
  func.func @transform_5(%arg0: i32) -> (i32, i32) {
    %c0_i32 = arith.constant 0 : i32
    %c0_i32_0 = arith.constant 0 : i32
    return %arg0, %c0_i32 : i32, i32
  }
}

</mosaic_0001>

<bundles_post_ra>
// kernel: _fwd.1
= control target key start
LH: loop header
LB: loop body
LE: loop exit
PB: predicated region body
PF: predicated region fallthrough
CT: control target
= control target key end

     0   :  { %v344_v1 = vmov 0.0   ;;  %vm345_vm0 = vmmov 0   ;;  %s442_s0 = inlined_call_operand.vmem [shape: f32[16,64], index: 0, kind: input, shape index: {}]   ;;  %s443_s1 = inlined_call_operand.vmem [shape: bf16[64,128], index: 1, kind: input, shape index: {}]   ;;  %s444_s2 = inlined_call_operand.vmem [shape: f32[1,128], index: 2, kind: input, shape index: {}]   ;;  %s445_s3 = inlined_call_operand.vmem [shape: bf16[128,64], index: 3, kind: input, shape index: {}]   ;;  %s446_s4 = inlined_call_operand.vmem [shape: f32[1,64], index: 4, kind: input, shape index: {}]   ;;  %s447_s5 = inlined_call_operand.hbm [shape: f32[16,64], index: 5, kind: output, shape index: {}]  }
   0x1   :  { %v308_v0 = vld [vmem:[%s443_s1] sm:$0xff]   ;;  %271 = vmatprep.subr.bf16.mxu0 %v344_v1  ;;  %283 = vmatprep.subr.bf16.mxu1 %v344_v1  ;;  %v309_v2 = vld [vmem:[%s443_s1 + $0x8] sm:$0xff]   ;;  %v310_v4 = vld [vmem:[%s443_s1 + $0x10] sm:$0xff]  }
   0x2   :  { %272 = vmatpush3.bf16.msra.mxu0 %v308_v0  ;;  %279 = vmatprep.mubr.msk.bf16.mxu0 %vm345_vm0, %v344_v1  ;;  %v312_v3 = vld [vmem:[%s445_s3] sm:$0xff]   ;;  %v313_v5 = vld [vmem:[%s445_s3 + $0x8] sm:$0xff]   ;;  %v311_v6 = vld [vmem:[%s443_s1 + $0x18] sm:$0xff]  }
   0x3   :  { %273 = vmatprep.subr.bf16.mxu0 %v344_v1  ;;  %299 = vmatprep.mubr.msk.bf16.mxu1 %vm345_vm0, %v344_v1  ;;  %v22_v7 = vld [vmem:[%s442_s0] sm:$0xff]  ;;  %v23_v8 = vld [vmem:[%s442_s0 + $0x8] sm:$0xff]  ;;  %v314_v9 = vld [vmem:[%s445_s3 + $0x10] sm:$0xff]  }
   0x4   :  { %284 = vmatpush3.bf16.msra.mxu1 %v312_v3 }
   0x5   :  { %285 = vmatprep.subr.bf16.mxu1 %v344_v1 }
   0x6   :  { %274 = vmatpush3.bf16.msra.mxu0 %v309_v2 }
   0x7   :  { %275 = vmatprep.subr.bf16.mxu0 %v344_v1 }
   0x8   :  { %286 = vmatpush3.bf16.msra.mxu1 %v313_v5 }
   0x9   :  { %287 = vmatprep.subr.bf16.mxu1 %v344_v1 }
   0xa   :  { %276 = vmatpush3.bf16.msra.mxu0 %v310_v4 }
   0xb   :  { %277 = vmatprep.subr.bf16.mxu0 %v344_v1 }
   0xc   :  { %10 = vsyncpa [#allocation3], 0  ;;  %v24_v10 = vpack.c.bf16 %v23_v8, %v22_v7  ;;  %vm64_vm1 = vcmask 523264   ;;  %288 = vmatpush3.bf16.msra.mxu1 %v314_v9  ;;  %v315_v11 = vld [vmem:[%s445_s3 + $0x18] sm:$0xff]   ;;  %v316_v12 = vld [vmem:[%s445_s3 + $0x20] sm:$0xff]  }
   0xd   :  { %289 = vmatprep.subr.bf16.mxu1 %v344_v1  ;;  %v317_v13 = vld [vmem:[%s445_s3 + $0x28] sm:$0xff]   ;;  %v318_v14 = vld [vmem:[%s445_s3 + $0x30] sm:$0xff]   ;;  %v319_v15 = vld [vmem:[%s445_s3 + $0x38] sm:$0xff]   ;;  %s346_s3 = smov [#allocation2]  }
   0xe   :  { %278 = vmatpush3.bf16.msra.mxu0 %v311_v6  ;;  %v242_v16 = vld [vmem:[%s444_s2] ss:$0 sm:$0xff]  ;;  %s231_s23 = sshll.u32 %s346_s3, 4  ;;  %s232_s23 = int_to_ptr.vmem [resolvable:$true] %s231_s23 }
   0xf   :  { %v248_v26 = vld [vmem:[%s446_s4] ss:$0 sm:$0xff]  ;;  %s320_s2 = scalar_lea.vmem %s232_s23, 256  ;;  %p325_p1 = scmp.lt.s32.totalorder %s232_s23, %s232_s23 }
  0x10   :  { %290 = vmatpush3.bf16.msra.mxu1 %v315_v11  ;;  %p321_p0 = scmp.ne.s32.totalorder %s232_s23, %s320_s2  ;;  %p326_p2 = scmp.lt.s32.totalorder %s320_s2, %s320_s2 }
  0x11   :  { %280 = vmatmul.mubr.msk.bf16.vlgmr.msra.gmra.mrb[0].mxu0 %vm64_vm1, %v24_v10  ;;  %291 = vmatprep.subr.bf16.mxu1 %v344_v1 }
  0x12   :  { %p327_p3 = por %p326_p2, %p325_p1 }
  0x14   :  { %292 = vmatpush3.bf16.msra.mxu1 %v316_v12  ;;  %p328_p4 = pnand %p327_p3, %p321_p0 }
  0x15   :  { %293 = vmatprep.subr.bf16.mxu1 %v344_v1 }
  0x18   :  { %294 = vmatpush3.bf16.msra.mxu1 %v317_v13 }
  0x19   :  { %295 = vmatprep.subr.bf16.mxu1 %v344_v1 }
  0x1c   :  { %296 = vmatpush3.bf16.msra.mxu1 %v318_v14 }
  0x1d   :  { %297 = vmatprep.subr.bf16.mxu1 %v344_v1 }
  0x20   :  { %298 = vmatpush3.bf16.msra.mxu1 %v319_v15 }
  0xe4   :  { %v102_v17 = vpop.f32.mrb[0].mxu0 }
  0xe5   :  { %v103_v18 = vadd.f32 %v242_v16, %v102_v17  ;;  %v281_v19 = vpop.f32.mrb[1].mxu0 }
  0xe6   :  { %v105_v20 = vpop.f32.mrb[2].mxu0 }
  0xe7   :  { %v106_v21 = vadd.f32 %v242_v16, %v105_v20  ;;  %v282_v22 = vpop.f32.mrb[3].mxu0  ;;  %v109_v23 = vmax.f32 %v103_v18, 0.0 }
  0xe9   :  { %v110_v24 = vmax.f32 %v106_v21, 0.0 }
  0xeb   :  { %v111_v25 = vpack.c.bf16 %v110_v24, %v109_v23 }
  0xed   :  { %300 = vmatmul.mubr.bf16.vlgmr.msra.gmra.mrb[0].mxu1 %v111_v25 }
 0x1c0   :  { %v217_v27 = vpop.f32.mrb[0].mxu1 }
 0x1c1   :  { %v218_v28 = vadd.f32 %v248_v26, %v217_v27  ;;  %v301_v29 = vpop.f32.mrb[1].mxu1 }
 0x1c2   :  { %v220_v30 = vpop.f32.mrb[2].mxu1 }
 0x1c3   :  { %224 = vst.msk [vmem:[#allocation2] sm:$0xff] %vm64_vm1, %v218_v28  ;;  %v221_v31 = vadd.f32 %v248_v26, %v220_v30  ;;  %v302_v32 = vpop.f32.mrb[3].mxu1 }
 0x1c5   :  { %225 = vst.msk [vmem:[#allocation2 + $0x8] sm:$0xff] %vm64_vm1, %v221_v31 }
 0x1c6   :  { %331 = shalt.err (!%p328_p4)
}
 0x1c7   :  { %s332_s25 = scalar_lea.hbm %s447_s5, 256 }
 0x1c8   :  { %p333_p5 = scmp.ne.s32.totalorder %s447_s5, %s332_s25  ;;  %p336_p6 = scmp.lt.u32.totalorder %s332_s25, %s447_s5 }
 0x1ca   :  { %p338_p7 = pnand %p336_p6, %p333_p5 }
 0x1cc   :  { %341 = shalt.err (!%p338_p7)
}
 0x1cd   :  { %s347_s30 = smov 128   ;;  %s348_s6 = smov 8  }
 0x1ce   :  { %237 = dma.vmem_to_hbm [thread:$0]  %s232_s23, 256, %s447_s5, [#allocation3], %s347_s30, %s347_s30, %s348_s6  }
 0x1cf   :  { %342 = dma.done.wait [#allocation3], 256  }
 0x1d0   :  { %343 = vsyncadd [#allocation3], 4294967040 }
 0x1d1   :  { %241 = vsyncpa [#allocation3], 1 }

</bundles_post_ra>
